<compile_context>
chip_gen: v6e
topology: v6e:2x2x1
jax: 0.10.0
libtpu: 0.0.40
codegen_flags: <defaults>
</compile_context>

<pallas_src>
import functools

import jax
import jax.numpy as jnp
from jax.experimental import pallas as pl
from jax.experimental.pallas import tpu as pltpu


_LANE = 128
_SUBLANE_BY_ITEMSIZE = {4: 8, 2: 16, 1: 32}


def _round_up(x, m):
    return ((x + m - 1) // m) * m


def _cast(v, dtype):
    """Cast only when needed (no-op for matching dtypes)."""
    return v if v.dtype == dtype else v.astype(dtype)


def _tile_bytes(rows, cols, dtype):
    """VMEM bytes of a (rows, cols) tile after lane(128)/sublane padding."""
    d = jnp.dtype(dtype)
    sub = _SUBLANE_BY_ITEMSIZE.get(d.itemsize, 8)
    return (_round_up(max(int(rows), 1), sub)
            * _round_up(max(int(cols), 1), _LANE) * d.itemsize)


def _default_vmem_budget_bytes():
    """Generation-aware scoped-VMEM budget (v7x: 64 MiB/TC; v5e/v6e: 128 MiB)."""
    try:
        cap = int(pltpu.get_tpu_info().vmem_capacity_bytes)
    except Exception:
        cap = 64 * 1024 * 1024  # assume the smallest (v7x-like) capacity
    return min(int(0.75 * cap), 96 * 1024 * 1024)


def _prediction_kernel(*refs, mid_layers: bool, res_con: bool):
    """Fused forward: 2 or 4 matmuls + ReLUs + residual, all in VMEM."""
    if mid_layers:
        (x_ref, w1_ref, b1_ref, wm1_ref, bm1_ref,
         wm2_ref, bm2_ref, w2_ref, b2_ref, o_ref) = refs
    else:
        x_ref, w1_ref, b1_ref, w2_ref, b2_ref, o_ref = refs

    cdtype = w1_ref.dtype  # features were cast to this dtype at the boundary

    # hid = relu(out_mlp1(features))    (f32 accumulation, f32 bias/ReLU)
    hid = jnp.dot(x_ref[...], w1_ref[...],
                  preferred_element_type=jnp.float32) + b1_ref[...]
    hid = jnp.maximum(hid, 0.0)

    if mid_layers:
        # mid = relu(mid_mlp1(hid)); mid = relu(mid_mlp2(mid))
        mid = jnp.dot(_cast(hid, cdtype), wm1_ref[...],
                      preferred_element_type=jnp.float32) + bm1_ref[...]
        mid = jnp.maximum(mid, 0.0)
        mid = jnp.dot(_cast(mid, cdtype), wm2_ref[...],
                      preferred_element_type=jnp.float32) + bm2_ref[...]
        mid = jnp.maximum(mid, 0.0)
        hid = hid + mid if res_con else mid

    # out = out_mlp2(hid)    (out_dim-wide, un-padded store)
    out = jnp.dot(_cast(hid, cdtype), w2_ref[...],
                  preferred_element_type=jnp.float32) + b2_ref[...]
    o_ref[...] = out.astype(o_ref.dtype)


def prediction_forward(features, params, *, mid_layers=True, res_con=True,
                       batch_tile=None, vmem_budget_bytes=None):
    """Pallas wrapper. features: (B, in_feature); returns (B, out_dim) f32."""
    B, in_feature = features.shape
    w1, b1, wm1, bm1, wm2, bm2, w2, b2 = params

    # Compute dtype follows the feature stream (the dominant, per-row HBM
    # traffic). Weights are fetched once, so casting them here is a cheap
    # one-time op; biases stay f32 (added after f32 accumulation).
    cdtype = features.dtype
    w1, wm1, wm2, w2 = (_cast(w, cdtype) for w in (w1, wm1, wm2, w2))
    b1, bm1, bm2, b2 = (_cast(b, jnp.float32) for b in (b1, bm1, bm2, b2))

    hid_units = w1.shape[1]
    mid_units = wm1.shape[1]
    out_dim = w2.shape[1]

    if vmem_budget_bytes is None:
        vmem_budget_bytes = _default_vmem_budget_bytes()

    granule = _SUBLANE_BY_ITEMSIZE.get(jnp.dtype(cdtype).itemsize, 8)

    # ---- layout-aware VMEM estimate (lane/sublane padded tiles) ------------
    weight_tiles = [(w1.shape, cdtype), ((1, hid_units), jnp.float32),
                    (w2.shape, cdtype), ((1, out_dim), jnp.float32)]
    if mid_layers:
        weight_tiles += [(wm1.shape, cdtype), ((1, mid_units), jnp.float32),
                         (wm2.shape, cdtype), ((1, hid_units), jnp.float32)]
    weight_bytes = sum(_tile_bytes(s[0], s[1], d) for s, d in weight_tiles)
    widest = max(hid_units, mid_units if mid_layers else 0, out_dim)

    def vmem_estimate(tb):
        est = 2 * _tile_bytes(tb, in_feature, cdtype)        # input double buffer
        est += 2 * _tile_bytes(tb, out_dim, jnp.float32)     # output double buffer
        est += 2 * weight_bytes                              # weight double buffers
        est += 4 * _tile_bytes(tb, widest, jnp.float32)      # live intermediates
        return est

    def fits(tb):
        return vmem_estimate(tb) <= 0.75 * vmem_budget_bytes  # ~25% headroom

    def align_tile(t):
        t = max(int(t), granule)
        if t >= 512:
            return (t // 256) * 256        # v6e/v7x MXU M granule
        if t >= 128:
            return (t // 128) * 128        # v5e MXU M granule
        return (t // granule) * granule    # sublane granule (8 f32 / 16 bf16)

    # ---- batch tile: largest tile <= 2048 that keeps >= 2 grid steps -------
    if batch_tile is not None:
        tb = align_tile(batch_tile)
    else:
        tb = B // 2 if B >= 2 * granule else B
        tb = align_tile(min(max(tb, granule), 2048))
    while tb > granule and not fits(tb):
        tb = align_tile(tb // 2)

    # ---- ragged batch: zero-pad rows (sliced off on return) ----------------
    B_pad = _round_up(B, tb)
    if B_pad != B:
        features = jnp.pad(features, ((0, B_pad - B), (0, 0)))
    grid = (B_pad // tb,)

    kernel = functools.partial(_prediction_kernel,
                               mid_layers=mid_layers, res_con=res_con)

    in_specs = [
        pl.BlockSpec((tb, in_feature), lambda i: (i, 0)),          # features
        pl.BlockSpec((in_feature, hid_units), lambda i: (0, 0)),   # out_mlp1 W
        pl.BlockSpec((1, hid_units), lambda i: (0, 0)),            # out_mlp1 b
    ]
    args = [features, w1, b1]
    if mid_layers:
        in_specs += [
            pl.BlockSpec((hid_units, mid_units), lambda i: (0, 0)),  # mid_mlp1 W
            pl.BlockSpec((1, mid_units), lambda i: (0, 0)),          # mid_mlp1 b
            pl.BlockSpec((mid_units, hid_units), lambda i: (0, 0)),  # mid_mlp2 W
            pl.BlockSpec((1, hid_units), lambda i: (0, 0)),          # mid_mlp2 b
        ]
        args += [wm1, bm1, wm2, bm2]
    in_specs += [
        pl.BlockSpec((hid_units, out_dim), lambda i: (0, 0)),      # out_mlp2 W
        pl.BlockSpec((1, out_dim), lambda i: (0, 0)),              # out_mlp2 b
    ]
    args += [w2, b2]

    out = pl.pallas_call(
        kernel,
        out_shape=jax.ShapeDtypeStruct((B_pad, out_dim), jnp.float32),
        grid_spec=pltpu.PrefetchScalarGridSpec(
            num_scalar_prefetch=0,
            grid=grid,
            in_specs=in_specs,
            out_specs=pl.BlockSpec((tb, out_dim), lambda i: (i, 0)),
        ),
        compiler_params=pltpu.CompilerParams(
            dimension_semantics=("parallel",),      # shards batch across TCs (v7x)
            vmem_limit_bytes=int(vmem_budget_bytes),
        ),
    )(*args)

    return out[:B] if B_pad != B else out


def init_params(key, in_feature, hid_units, out_dim, contract, *,
                weights_dtype=jnp.float32):
    """Deterministic synthetic parameters (shapes match the nn.Linear layers)."""
    mid_units = max(1, hid_units // contract)
    ks = jax.random.split(key, 8)

    def lin(kw, kb, fan_in, fan_out):
        bound = 1.0 / jnp.sqrt(fan_in)
        w = jax.random.uniform(kw, (fan_in, fan_out), jnp.float32, -bound, bound)
        b = jax.random.uniform(kb, (1, fan_out), jnp.float32, -bound, bound)
        return w.astype(weights_dtype), b   # biases stay f32

    w1, b1 = lin(ks[0], ks[1], in_feature, hid_units)      # out_mlp1
    wm1, bm1 = lin(ks[2], ks[3], hid_units, mid_units)     # mid_mlp1
    wm2, bm2 = lin(ks[4], ks[5], mid_units, hid_units)     # mid_mlp2
    w2, b2 = lin(ks[6], ks[7], hid_units, out_dim)         # out_mlp2
    return (w1, b1, wm1, bm1, wm2, bm2, w2, b2)


def prediction_ref(features, params, *, mid_layers=True, res_con=True):
    """Pure-JAX reference of the PyTorch forward."""
    w1, b1, wm1, bm1, wm2, bm2, w2, b2 = params
    hid = jax.nn.relu(features @ w1 + b1)
    if mid_layers:
        mid = jax.nn.relu(hid @ wm1 + bm1)
        mid = jax.nn.relu(mid @ wm2 + bm2)
        hid = hid + mid if res_con else mid
    return hid @ w2 + b2


if __name__ == "__main__":
    # Small shapes consistent with the module; ragged batch exercises padding.
    batch = 260
    in_feature = 69
    hid_units = 32
    out_dim = 1
    contract = 1

    key = jax.random.PRNGKey(0)
    k_feat, k_par = jax.random.split(key)
    features = jax.random.normal(k_feat, (batch, in_feature), jnp.float32)

    # f32 path: tight numerical check over module configurations.
    params = init_params(k_par, in_feature, hid_units, out_dim, contract)
    for mid_layers, res_con in [(True, True), (True, False), (False, True)]:
        out = prediction_forward(features, params,
                                 mid_layers=mid_layers, res_con=res_con)
        out = jax.block_until_ready(out)
        ref = prediction_ref(features, params,
                             mid_layers=mid_layers, res_con=res_con)
        assert out.shape == (batch, out_dim)
        assert jnp.allclose(out, ref, atol=1e-5, rtol=1e-5), (
            f"f32 mismatch (mid_layers={mid_layers}, res_con={res_con})")

    # bf16 feature + weight path (v6e/v7x MXU): loose check vs pure-JAX ref.
    params_bf16 = init_params(k_par, in_feature, hid_units, out_dim, contract,
                              weights_dtype=jnp.bfloat16)
    feats_bf16 = features.astype(jnp.bfloat16)
    out_bf16 = jax.block_until_ready(prediction_forward(feats_bf16, params_bf16))
    ref_bf16 = prediction_ref(feats_bf16, params_bf16)
    assert out_bf16.shape == (batch, out_dim)
    assert jnp.allclose(out_bf16, jnp.asarray(ref_bf16, jnp.float32),
                        atol=1e-1, rtol=1e-1), "bf16 mismatch"

    print("KERNEL_OK")
</pallas_src>

<mosaic_0001>
module attributes {stable_mosaic.version = 11 : i64} {
  func.func @_prediction_kernel(%arg0: i32, %arg1: memref<128x69xf32, #tpu.memory_space<vmem>>, %arg2: memref<69x32xf32, #tpu.memory_space<vmem>>, %arg3: memref<1x32xf32, #tpu.memory_space<vmem>>, %arg4: memref<32x32xf32, #tpu.memory_space<vmem>>, %arg5: memref<1x32xf32, #tpu.memory_space<vmem>>, %arg6: memref<32x32xf32, #tpu.memory_space<vmem>>, %arg7: memref<1x32xf32, #tpu.memory_space<vmem>>, %arg8: memref<32x1xf32, #tpu.memory_space<vmem>>, %arg9: memref<1x1xf32, #tpu.memory_space<vmem>>, %arg10: memref<128x1xf32, #tpu.memory_space<vmem>>) attributes {dimension_semantics = [#tpu.dimension_semantics<parallel>], iteration_bounds = array<i64: 3>, scalar_prefetch = 0 : i64, scratch_operands = 0 : i64, tpu.core_type = #tpu.core_type<tc>, window_params = [{transform_indices = @transform_0, window_bounds = array<i64: 128, 69>}, {pipeline_mode = #tpu.pipeline_mode<synchronous>, transform_indices = @transform_1, window_bounds = array<i64: 69, 32>}, {pipeline_mode = #tpu.pipeline_mode<synchronous>, transform_indices = @transform_2, window_bounds = array<i64: 1, 32>}, {pipeline_mode = #tpu.pipeline_mode<synchronous>, transform_indices = @transform_3, window_bounds = array<i64: 32, 32>}, {pipeline_mode = #tpu.pipeline_mode<synchronous>, transform_indices = @transform_4, window_bounds = array<i64: 1, 32>}, {pipeline_mode = #tpu.pipeline_mode<synchronous>, transform_indices = @transform_5, window_bounds = array<i64: 32, 32>}, {pipeline_mode = #tpu.pipeline_mode<synchronous>, transform_indices = @transform_6, window_bounds = array<i64: 1, 32>}, {pipeline_mode = #tpu.pipeline_mode<synchronous>, transform_indices = @transform_7, window_bounds = array<i64: 32, 1>}, {pipeline_mode = #tpu.pipeline_mode<synchronous>, transform_indices = @transform_8, window_bounds = array<i64: 1, 1>}, {transform_indices = @transform_9, window_bounds = array<i64: 128, 1>}]} {
    %c0 = arith.constant 0 : index
    %c0_0 = arith.constant 0 : index
    %0 = vector.load %arg1[%c0, %c0_0] : memref<128x69xf32, #tpu.memory_space<vmem>>, vector<128x69xf32>
    %c0_1 = arith.constant 0 : index
    %c0_2 = arith.constant 0 : index
    %1 = vector.load %arg2[%c0_1, %c0_2] : memref<69x32xf32, #tpu.memory_space<vmem>>, vector<69x32xf32>
    %cst = arith.constant dense<0.000000e+00> : vector<128x32xf32>
    %2 = tpu.matmul %0, %1, %cst {dimension_numbers = #tpu.dot_dimension_numbers<[1], [0], [0], [1], [0, 0, 1, 1], [], []>} : vector<128x69xf32>, vector<69x32xf32>, vector<128x32xf32> -> vector<128x32xf32>
    %c0_3 = arith.constant 0 : index
    %c0_4 = arith.constant 0 : index
    %3 = vector.load %arg3[%c0_3, %c0_4] : memref<1x32xf32, #tpu.memory_space<vmem>>, vector<1x32xf32>
    %4 = vector.broadcast %3 : vector<1x32xf32> to vector<128x32xf32>
    %5 = arith.addf %2, %4 : vector<128x32xf32>
    %cst_5 = arith.constant 0.000000e+00 : f32
    %6 = vector.broadcast %cst_5 : f32 to vector<128x32xf32>
    %7 = arith.maximumf %5, %6 : vector<128x32xf32>
    %c0_6 = arith.constant 0 : index
    %c0_7 = arith.constant 0 : index
    %8 = vector.load %arg4[%c0_6, %c0_7] : memref<32x32xf32, #tpu.memory_space<vmem>>, vector<32x32xf32>
    %cst_8 = arith.constant dense<0.000000e+00> : vector<128x32xf32>
    %9 = tpu.matmul %7, %8, %cst_8 {dimension_numbers = #tpu.dot_dimension_numbers<[1], [0], [0], [1], [0, 0, 1, 1], [], []>} : vector<128x32xf32>, vector<32x32xf32>, vector<128x32xf32> -> vector<128x32xf32>
    %c0_9 = arith.constant 0 : index
    %c0_10 = arith.constant 0 : index
    %10 = vector.load %arg5[%c0_9, %c0_10] : memref<1x32xf32, #tpu.memory_space<vmem>>, vector<1x32xf32>
    %11 = vector.broadcast %10 : vector<1x32xf32> to vector<128x32xf32>
    %12 = arith.addf %9, %11 : vector<128x32xf32>
    %cst_11 = arith.constant 0.000000e+00 : f32
    %13 = vector.broadcast %cst_11 : f32 to vector<128x32xf32>
    %14 = arith.maximumf %12, %13 : vector<128x32xf32>
    %c0_12 = arith.constant 0 : index
    %c0_13 = arith.constant 0 : index
    %15 = vector.load %arg6[%c0_12, %c0_13] : memref<32x32xf32, #tpu.memory_space<vmem>>, vector<32x32xf32>
    %cst_14 = arith.constant dense<0.000000e+00> : vector<128x32xf32>
    %16 = tpu.matmul %14, %15, %cst_14 {dimension_numbers = #tpu.dot_dimension_numbers<[1], [0], [0], [1], [0, 0, 1, 1], [], []>} : vector<128x32xf32>, vector<32x32xf32>, vector<128x32xf32> -> vector<128x32xf32>
    %c0_15 = arith.constant 0 : index
    %c0_16 = arith.constant 0 : index
    %17 = vector.load %arg7[%c0_15, %c0_16] : memref<1x32xf32, #tpu.memory_space<vmem>>, vector<1x32xf32>
    %18 = vector.broadcast %17 : vector<1x32xf32> to vector<128x32xf32>
    %19 = arith.addf %16, %18 : vector<128x32xf32>
    %cst_17 = arith.constant 0.000000e+00 : f32
    %20 = vector.broadcast %cst_17 : f32 to vector<128x32xf32>
    %21 = arith.maximumf %19, %20 : vector<128x32xf32>
    %22 = arith.addf %7, %21 : vector<128x32xf32>
    %c0_18 = arith.constant 0 : index
    %c0_19 = arith.constant 0 : index
    %23 = vector.load %arg8[%c0_18, %c0_19] : memref<32x1xf32, #tpu.memory_space<vmem>>, vector<32x1xf32>
    %cst_20 = arith.constant dense<0.000000e+00> : vector<128x1xf32>
    %24 = tpu.matmul %22, %23, %cst_20 {dimension_numbers = #tpu.dot_dimension_numbers<[1], [0], [0], [1], [0, 0, 1, 1], [], []>} : vector<128x32xf32>, vector<32x1xf32>, vector<128x1xf32> -> vector<128x1xf32>
    %c0_21 = arith.constant 0 : index
    %c0_22 = arith.constant 0 : index
    %25 = vector.load %arg9[%c0_21, %c0_22] : memref<1x1xf32, #tpu.memory_space<vmem>>, vector<1x1xf32>
    %26 = vector.broadcast %25 : vector<1x1xf32> to vector<128x1xf32>
    %27 = arith.addf %24, %26 : vector<128x1xf32>
    %c0_23 = arith.constant 0 : index
    %c0_24 = arith.constant 0 : index
    %28 = vector.load %arg10[%c0_23, %c0_24] : memref<128x1xf32, #tpu.memory_space<vmem>>, vector<128x1xf32>
    tpu.vector_store %arg10[%c0_23, %c0_24], %27 {strides = array<i32>} : memref<128x1xf32, #tpu.memory_space<vmem>>, vector<128x1xf32>,
    return
  }
  func.func @transform_0(%arg0: i32) -> (i32, i32) {
    %c0_i32 = arith.constant 0 : i32
    %c0_i32_0 = arith.constant 0 : i32
    return %arg0, %c0_i32 : i32, i32
  }
  func.func @transform_1(%arg0: i32) -> (i32, i32) {
    %c0_i32 = arith.constant 0 : i32
    %c0_i32_0 = arith.constant 0 : i32
    %c0_i32_1 = arith.constant 0 : i32
    return %c0_i32, %c0_i32_0 : i32, i32
  }
  func.func @transform_2(%arg0: i32) -> (i32, i32) {
    %c0_i32 = arith.constant 0 : i32
    %c0_i32_0 = arith.constant 0 : i32
    %c0_i32_1 = arith.constant 0 : i32
    return %c0_i32, %c0_i32_0 : i32, i32
  }
  func.func @transform_3(%arg0: i32) -> (i32, i32) {
    %c0_i32 = arith.constant 0 : i32
    %c0_i32_0 = arith.constant 0 : i32
    %c0_i32_1 = arith.constant 0 : i32
    return %c0_i32, %c0_i32_0 : i32, i32
  }
  func.func @transform_4(%arg0: i32) -> (i32, i32) {
    %c0_i32 = arith.constant 0 : i32
    %c0_i32_0 = arith.constant 0 : i32
    %c0_i32_1 = arith.constant 0 : i32
    return %c0_i32, %c0_i32_0 : i32, i32
  }
  func.func @transform_5(%arg0: i32) -> (i32, i32) {
    %c0_i32 = arith.constant 0 : i32
    %c0_i32_0 = arith.constant 0 : i32
    %c0_i32_1 = arith.constant 0 : i32
    return %c0_i32, %c0_i32_0 : i32, i32
  }
  func.func @transform_6(%arg0: i32) -> (i32, i32) {
    %c0_i32 = arith.constant 0 : i32
    %c0_i32_0 = arith.constant 0 : i32
    %c0_i32_1 = arith.constant 0 : i32
    return %c0_i32, %c0_i32_0 : i32, i32
  }
  func.func @transform_7(%arg0: i32) -> (i32, i32) {
    %c0_i32 = arith.constant 0 : i32
    %c0_i32_0 = arith.constant 0 : i32
    %c0_i32_1 = arith.constant 0 : i32
    return %c0_i32, %c0_i32_0 : i32, i32
  }
  func.func @transform_8(%arg0: i32) -> (i32, i32) {
    %c0_i32 = arith.constant 0 : i32
    %c0_i32_0 = arith.constant 0 : i32
    %c0_i32_1 = arith.constant 0 : i32
    return %c0_i32, %c0_i32_0 : i32, i32
  }
  func.func @transform_9(%arg0: i32) -> (i32, i32) {
    %c0_i32 = arith.constant 0 : i32
    %c0_i32_0 = arith.constant 0 : i32
    return %arg0, %c0_i32 : i32, i32
  }
}

</mosaic_0001>

<bundles_post_ra>
// kernel: tpu_custom_call.1
= control target key start
LH: loop header
LB: loop body
LE: loop exit
PB: predicated region body
PF: predicated region fallthrough
CT: control target
= control target key end

     0   :  { %s1698_s11 = smov 0   ;;  %s2076_s0 = inlined_call_operand.vmem [shape: f32[384,69], index: 0, kind: input, shape index: {}]   ;;  %s2077_s1 = inlined_call_operand.vmem [shape: f32[69,32], index: 1, kind: input, shape index: {}]   ;;  %s2078_s2 = inlined_call_operand.vmem [shape: f32[1,32], index: 2, kind: input, shape index: {}]   ;;  %s2079_s3 = inlined_call_operand.vmem [shape: f32[32,32], index: 3, kind: input, shape index: {}]   ;;  %s2080_s4 = inlined_call_operand.vmem [shape: f32[1,32], index: 4, kind: input, shape index: {}]   ;;  %s2081_s5 = inlined_call_operand.vmem [shape: f32[32,32], index: 5, kind: input, shape index: {}]   ;;  %s2082_s6 = inlined_call_operand.vmem [shape: f32[1,32], index: 6, kind: input, shape index: {}]   ;;  %s2083_s7 = inlined_call_operand.vmem [shape: f32[32,1], index: 7, kind: input, shape index: {}]   ;;  %s2084_s8 = inlined_call_operand.<no memory space> [shape: f32[1,1], index: 8, kind: input, shape index: {}]   ;;  %s2085_s9 = inlined_call_operand.vmem [shape: f32[384,1], index: 9, kind: output, shape index: {}]  }
   0x1   :  { %v14_v0 = vstv %s2084_s8 }
   0x2   :  { %15 = vst [vmem:[#allocation2] sm:$0x1] %v14_v0 }
   0x3 LB: > { %s1318_s12 = sadd.s32 4294967295, %s1643_s11   ;;  %p1322_p0 = scmp.ge.s32.totalorder %s1643_s11, 1  ;;  %s1643_s11 = sphi %s1698_s11, %s21_s11  }
   0x4   : > { %p290_p1 = scmp.lt.s32.totalorder %s1643_s11, 4 }
   0x6   : > { %p291_p2 = pnand %p1322_p0, %p290_p1 }
   0x7   : > { %s1323_s16 = sshll.u32 (!%p291_p2), %s1318_s12, 4 }
   0x8   : > { %294 = sbr.rel (%p291_p2) target bundleno = 860 (0x35c), region = 56  ;;  %p327_p3 = scmp.lt.s32.totalorder (!%p291_p2), %s1323_s16, 47 }
   0xd   : > { %v362_v1 = vld [vmem:[%s2077_s1 + $0x40] sm:$0x1f]  ;;  %vm419_vm0 = vcmask 1044480   ;;  %v361_v2 = vld [vmem:[%s2077_s1 + $0x38] sm:$0xff]  ;;  %v360_v3 = vld [vmem:[%s2077_s1 + $0x30] sm:$0xff]  ;;  %s2087_s16 = smov (!%p327_p3, %s1323_s16), 47 }
   0xe   : > { %1483 = vmatprep.subr.msk.mxu0 %vm419_vm0, %v362_v1  ;;  %v359_v4 = vld [vmem:[%s2077_s1 + $0x28] sm:$0xff]  ;;  %s1324_s21 = sshll.u32 %s2087_s16, 3  ;;  %vm370_vm1 = vcmask 564224   ;;  %v358_v5 = vld [vmem:[%s2077_s1 + $0x20] sm:$0xff]  ;;  %v357_v7 = vld [vmem:[%s2077_s1 + $0x18] sm:$0xff]  ;;  %vm595_vm2 = vcmask 261120  }
   0xf   : > { %1484 = vmatpush3.msk.msra.mxu0 %vm419_vm0, %v362_v1  ;;  %s1729_s26 = scalar_lea.vmem %s2076_s0, %s1324_s21  ;;  %v356_v8 = vld [vmem:[%s2077_s1 + $0x10] sm:$0xff]  ;;  %v355_v9 = vld [vmem:[%s2077_s1 + $0x8] sm:$0xff]  ;;  %v354_v10 = vld [vmem:[%s2077_s1] sm:$0xff]  ;;  %s2039_s29 = scalar_lea.vmem %s2085_s9, %s1324_s21  ;;  %vm1245_vm3 = vcmask 7168  }
  0x10   : > { %1485 = vmatprep.subr.mxu0 %v361_v2  ;;  %v338_v6 = vld [vmem:[%s1729_s26] sm:$0xff]  ;;  %v339_v11 = vld [vmem:[%s1729_s26 + $0x8] sm:$0xff]  ;;  %v340_v12 = vld [vmem:[%s1729_s26 + $0x10] sm:$0xff] }
  0x11   : > { %1486 = vmatpush3.msra.mxu0 %v361_v2  ;;  %1501 = vmatprep.mubr.msk.f32.mxu0 %vm370_vm1, %v338_v6  ;;  %v341_v13 = vld [vmem:[%s1729_s26 + $0x18] sm:$0xff]  ;;  %v342_v14 = vld [vmem:[%s1729_s26 + $0x20] sm:$0xff]  ;;  %v343_v15 = vld [vmem:[%s1729_s26 + $0x28] sm:$0xff] }
  0x12   : > { %1487 = vmatprep.subr.mxu0 %v360_v3  ;;  %v344_v16 = vld [vmem:[%s1729_s26 + $0x30] sm:$0xff]  ;;  %v345_v17 = vld [vmem:[%s1729_s26 + $0x38] sm:$0xff]  ;;  %v346_v18 = vld [vmem:[%s1729_s26 + $0x40] sm:$0xff] }
  0x13   : > { %1488 = vmatpush3.msra.mxu0 %v360_v3  ;;  %v347_v19 = vld [vmem:[%s1729_s26 + $0x48] sm:$0xff]  ;;  %v348_v20 = vld [vmem:[%s1729_s26 + $0x50] sm:$0xff]  ;;  %v349_v21 = vld [vmem:[%s1729_s26 + $0x58] sm:$0xff] }
  0x14   : > { %1489 = vmatprep.subr.mxu0 %v359_v4  ;;  %v350_v22 = vld [vmem:[%s1729_s26 + $0x60] sm:$0xff]  ;;  %v351_v23 = vld [vmem:[%s1729_s26 + $0x68] sm:$0xff]  ;;  %v352_v24 = vld [vmem:[%s1729_s26 + $0x70] sm:$0xff] }
  0x15   : > { %1490 = vmatpush3.msra.mxu0 %v359_v4  ;;  %v353_v25 = vld [vmem:[%s1729_s26 + $0x78] sm:$0xff]  ;;  %v586_v27 = vld [vmem:[%s2079_s3 + $0x10] sm:$0xff]  ;;  %v585_v28 = vld [vmem:[%s2079_s3 + $0x8] sm:$0xff] }
  0x16   : > { %1491 = vmatprep.subr.mxu0 %v358_v5  ;;  %v587_v26 = vld [vmem:[%s2079_s3 + $0x18] sm:$0xff]  ;;  %v584_v29 = vld [vmem:[%s2079_s3] sm:$0xff]  ;;  %v807_v42 = vld [vmem:[%s2081_s5 + $0x10] sm:$0xff] }
  0x17   : > { %1492 = vmatpush3.msra.mxu0 %v358_v5  ;;  %1525 = vmatprep.subr.mxu1 %v587_v26  ;;  %v808_v30 = vld [vmem:[%s2081_s5 + $0x18] sm:$0xff]  ;;  %v1793_v31 = vld [vmem:[%s2078_s2] ss:$0 sm:$0xff]  ;;  %v806_v45 = vld [vmem:[%s2081_s5 + $0x8] sm:$0xff] }
  0x18   : > { %1493 = vmatprep.subr.mxu0 %v357_v7  ;;  %1526 = vmatpush3.msra.mxu1 %v587_v26  ;;  %v805_v50 = vld [vmem:[%s2081_s5] sm:$0xff] }
  0x19   : > { %1494 = vmatpush3.msra.mxu0 %v357_v7  ;;  %1527 = vmatprep.subr.mxu1 %v586_v27 }
  0x1a   : > { %1495 = vmatprep.subr.mxu0 %v356_v8  ;;  %1528 = vmatpush3.msra.mxu1 %v586_v27 }
  0x1b   : > { %1496 = vmatpush3.msra.mxu0 %v356_v8  ;;  %1529 = vmatprep.subr.mxu1 %v585_v28 }
  0x1c   : > { %1497 = vmatprep.subr.mxu0 %v355_v9  ;;  %1530 = vmatpush3.msra.mxu1 %v585_v28 }
  0x1d   : > { %1498 = vmatpush3.msra.mxu0 %v355_v9  ;;  %1531 = vmatprep.subr.mxu1 %v584_v29 }
  0x1e   : > { %1499 = vmatprep.subr.mxu0 %v354_v10  ;;  %1532 = vmatpush3.msra.mxu1 %v584_v29 }
  0x1f   : > { %1500 = vmatpush3.msra.mxu0 %v354_v10  ;;  %1557 = vmatprep.subr.mxu1 %v808_v30 }
  0x20   : > { %1502 = vmatmul.mubr.msk.f32.vlgmr.msra.gmra.mxu0 %vm370_vm1, %v339_v11 }
  0x21   : > { %1504 = vmatprep.mubr.msk.f32.mxu0 %vm370_vm1, %v340_v12 }
  0x24   : > { %1505 = vmatmul.mubr.msk.f32.gmra.mxu0 %vm370_vm1, %v341_v13 }
  0x25   : > { %1507 = vmatprep.mubr.msk.f32.mxu0 %vm370_vm1, %v342_v14 }
  0x28   : > { %1508 = vmatmul.mubr.msk.f32.gmra.mxu0 %vm370_vm1, %v343_v15 }
  0x29   : > { %1510 = vmatprep.mubr.msk.f32.mxu0 %vm370_vm1, %v344_v16 }
  0x2c   : > { %1511 = vmatmul.mubr.msk.f32.gmra.mxu0 %vm370_vm1, %v345_v17 }
  0x2d   : > { %1513 = vmatprep.mubr.msk.f32.mxu0 %vm370_vm1, %v346_v18 }
  0x30   : > { %1514 = vmatmul.mubr.msk.f32.gmra.mxu0 %vm370_vm1, %v347_v19  ;;  %v1044_v19 = vld [vmem:[%s2083_s7 + $0x18] sm:$0xff] }
  0x31   : > { %1516 = vmatprep.mubr.msk.f32.mxu0 %vm370_vm1, %v348_v20  ;;  %v1043_v20 = vld [vmem:[%s2083_s7 + $0x10] sm:$0xff]  ;;  %1589 = vmatprep.subr.mxu0 %v1044_v19 }
  0x32   : > { %1590 = vmatpush3.msra.mxu0 %v1044_v19 }
  0x33   : > { %1591 = vmatprep.subr.mxu0 %v1043_v20 }
  0x34   : > { %1517 = vmatmul.mubr.msk.f32.gmra.mxu0 %vm370_vm1, %v349_v21  ;;  %v1042_v21 = vld [vmem:[%s2083_s7 + $0x8] sm:$0xff] }
  0x35   : > { %1519 = vmatprep.mubr.msk.f32.mxu0 %vm370_vm1, %v350_v22  ;;  %1592 = vmatpush3.msra.mxu0 %v1043_v20  ;;  %v1928_v22 = vld [vmem:[%s2080_s4] ss:$0 sm:$0xff] }
  0x36   : > { %1593 = vmatprep.subr.mxu0 %v1042_v21 }
  0x37   : > { %1594 = vmatpush3.msra.mxu0 %v1042_v21 }
  0x38   : > { %1520 = vmatmul.mubr.msk.f32.gmra.mxu0 %vm370_vm1, %v351_v23 }
  0x39   : > { %1522 = vmatprep.mubr.msk.f32.mxu0 %vm370_vm1, %v352_v24 }
  0x3c   : > { %1523 = vmatmul.mubr.msk.f32.gmra.mxu0 %vm370_vm1, %v353_v25 }
  0xe0   : > { %v1503_v32 = vpop.f32.mrf.mxu0 }
  0xe1   : > { %v1796_v33 = vadd.f32 %v1503_v32, %v1793_v31 }
  0xe2   : > { %v489_v34 = vpop.f32.mrf.mxu0 }
  0xe3   : > { %v1799_v35 = vadd.f32 %v1793_v31, %v489_v34  ;;  %v569_v38 = vmax.f32 %v1796_v33, 0.0 }
  0xe4   : > { %v1506_v36 = vpop.f32.mrf.mxu0 }
  0xe5   : > { %v568_v37 = vmax.f32 %v1799_v35, 0.0  ;;  %v1804_v39 = vadd.f32 %v1506_v36, %v1793_v31 }
  0xe6   : > { %v499_v40 = vpop.f32.mrf.mxu0 }
  0xe7   : > { %v1807_v41 = vadd.f32 %v1793_v31, %v499_v40  ;;  %1533 = vmatprep.mubr.msk.f32.mxu1 %vm595_vm2, %v568_v37  ;;  %v571_v46 = vmax.f32 %v1804_v39, 0.0 }
  0xe8   : > { %v1509_v43 = vpop.f32.mrf.mxu0  ;;  %1534 = vmatmul.mubr.msk.f32.vlgmr.msra.gmra.mxu1 %vm595_vm2, %v569_v38 }
  0xe9   : > { %v570_v44 = vmax.f32 %v1807_v41, 0.0  ;;  %1558 = vmatpush3.msra.mxu1 %v808_v30  ;;  %v1824_v47 = vadd.f32 %v1509_v43, %v1793_v31 }
  0xea   : > { %v509_v48 = vpop.f32.mrf.mxu0  ;;  %1559 = vmatprep.subr.mxu1 %v807_v42 }
  0xeb   : > { %v1827_v49 = vadd.f32 %v1793_v31, %v509_v48  ;;  %1536 = vmatprep.mubr.msk.f32.mxu1 %vm595_vm2, %v570_v44  ;;  %1560 = vmatpush3.msra.mxu1 %v807_v42  ;;  %v573_v53 = vmax.f32 %v1824_v47, 0.0 }
  0xec   : > { %v1512_v51 = vpop.f32.mrf.mxu0  ;;  %1537 = vmatmul.mubr.msk.f32.gmra.mxu1 %vm595_vm2, %v571_v46  ;;  %1561 = vmatprep.subr.mxu1 %v806_v45 }
  0xed   : > { %v572_v52 = vmax.f32 %v1827_v49, 0.0  ;;  %1562 = vmatpush3.msra.mxu1 %v806_v45  ;;  %v1841_v54 = vadd.f32 %v1512_v51, %v1793_v31 }
  0xee   : > { %v519_v55 = vpop.f32.mrf.mxu0  ;;  %1563 = vmatprep.subr.mxu1 %v805_v50 }
  0xef   : > { %v1844_v56 = vadd.f32 %v1793_v31, %v519_v55  ;;  %1539 = vmatprep.mubr.msk.f32.mxu1 %vm595_vm2, %v572_v52  ;;  %1564 = vmatpush3.msra.mxu1 %v805_v50  ;;  %v575_v59 = vmax.f32 %v1841_v54, 0.0 }
  0xf0   : > { %v1515_v57 = vpop.f32.mrf.mxu0  ;;  %1540 = vmatmul.mubr.msk.f32.gmra.mxu1 %vm595_vm2, %v573_v53  ;;  %1621 = vmatprep.subr.mxu1 %v1044_v19 }
  0xf1   : > { %v574_v58 = vmax.f32 %v1844_v56, 0.0  ;;  %v1855_v60 = vadd.f32 %v1515_v57, %v1793_v31 }
  0xf2   : > { %v529_v61 = vpop.f32.mrf.mxu0 }
  0xf3   : > { %v1858_v62 = vadd.f32 %v1793_v31, %v529_v61  ;;  %1542 = vmatprep.mubr.msk.f32.mxu1 %vm595_vm2, %v574_v58  ;;  %v577_v1 = vmax.f32 %v1855_v60, 0.0 }
  0xf4   : > { %v1518_v63 = vpop.f32.mrf.mxu0  ;;  %1543 = vmatmul.mubr.msk.f32.gmra.mxu1 %vm595_vm2, %v575_v59 }
  0xf5   : > { %v576_v0 = vmax.f32 %v1858_v62, 0.0  ;;  %v1869_v2 = vadd.f32 %v1518_v63, %v1793_v31 }
  0xf6   : > { %v539_v3 = vpop.f32.mrf.mxu0 }
  0xf7   : > { %v1872_v4 = vadd.f32 %v1793_v31, %v539_v3  ;;  %1545 = vmatprep.mubr.msk.f32.mxu1 %vm595_vm2, %v576_v0  ;;  %v579_v7 = vmax.f32 %v1869_v2, 0.0 }
  0xf8   : > { %v1521_v5 = vpop.f32.mrf.mxu0  ;;  %1546 = vmatmul.mubr.msk.f32.gmra.mxu1 %vm595_vm2, %v577_v1 }
  0xf9   : > { %v578_v6 = vmax.f32 %v1872_v4, 0.0  ;;  %v1883_v8 = vadd.f32 %v1521_v5, %v1793_v31 }
  0xfa   : > { %v549_v9 = vpop.f32.mrf.mxu0 }
  0xfb   : > { %v1886_v10 = vadd.f32 %v1793_v31, %v549_v9  ;;  %1548 = vmatprep.mubr.msk.f32.mxu1 %vm595_vm2, %v578_v6  ;;  %v581_v13 = vmax.f32 %v1883_v8, 0.0 }
  0xfc   : > { %v1524_v11 = vpop.f32.mrf.mxu0  ;;  %1549 = vmatmul.mubr.msk.f32.gmra.mxu1 %vm595_vm2, %v579_v7 }
  0xfd   : > { %v580_v12 = vmax.f32 %v1886_v10, 0.0  ;;  %v1897_v14 = vadd.f32 %v1524_v11, %v1793_v31  ;;  %v1379_v10 = vld [vmem:[#allocation2] ss:$0 sm:$0xff] }
  0xfe   : > { %v559_v15 = vpop.f32.mrf.mxu0 }
  0xff   : > { %v1900_v16 = vadd.f32 %v1793_v31, %v559_v15  ;;  %1551 = vmatprep.mubr.msk.f32.mxu1 %vm595_vm2, %v580_v12  ;;  %v583_v18 = vmax.f32 %v1897_v14, 0.0 }
 0x100   : > { %1552 = vmatmul.mubr.msk.f32.gmra.mxu1 %vm595_vm2, %v581_v13 }
 0x101   : > { %v582_v17 = vmax.f32 %v1900_v16, 0.0 }
 0x103   : > { %1554 = vmatprep.mubr.msk.f32.mxu1 %vm595_vm2, %v582_v17 }
 0x104   : > { %1555 = vmatmul.mubr.msk.f32.gmra.mxu1 %vm595_vm2, %v583_v18 }
 0x1a8   : > { %v1535_v23 = vpop.f32.mrf.mxu1 }
 0x1a9   : > { %v716_v24 = vadd.f32 %v1535_v23, %v1928_v22 }
 0x1aa   : > { %v710_v25 = vpop.f32.mrf.mxu1 }
 0x1ab   : > { %v711_v26 = vadd.f32 %v1928_v22, %v710_v25  ;;  %v790_v29 = vmax.f32 %v716_v24, 0.0 }
 0x1ac   : > { %v1538_v27 = vpop.f32.mrf.mxu1 }
 0x1ad   : > { %v789_v28 = vmax.f32 %v711_v26, 0.0  ;;  %v726_v30 = vadd.f32 %v1538_v27, %v1928_v22 }
 0x1ae   : > { %v720_v31 = vpop.f32.mrf.mxu1 }
 0x1af   : > { %v721_v32 = vadd.f32 %v1928_v22, %v720_v31  ;;  %1565 = vmatprep.mubr.msk.f32.mxu1 %vm595_vm2, %v789_v28  ;;  %v792_v40 = vmax.f32 %v726_v30, 0.0 }
 0x1b0   : > { %v1541_v34 = vpop.f32.mrf.mxu1  ;;  %1566 = vmatmul.mubr.msk.f32.vlgmr.msra.gmra.mxu1 %vm595_vm2, %v790_v29 }
 0x1b1   : > { %v791_v36 = vmax.f32 %v721_v32, 0.0  ;;  %1625 = vmatpush3.msra.mxu1 %v1044_v19  ;;  %v736_v42 = vadd.f32 %v1541_v34, %v1928_v22 }
 0x1b2   : > { %v730_v43 = vpop.f32.mrf.mxu1  ;;  %1622 = vmatprep.subr.mxu1 %v1043_v20 }
 0x1b3   : > { %v731_v45 = vadd.f32 %v1928_v22, %v730_v43  ;;  %1568 = vmatprep.mubr.msk.f32.mxu1 %vm595_vm2, %v791_v36  ;;  %1626 = vmatpush3.msra.mxu1 %v1043_v20  ;;  %v794_v51 = vmax.f32 %v736_v42, 0.0 }
 0x1b4   : > { %v1544_v48 = vpop.f32.mrf.mxu1  ;;  %1569 = vmatmul.mubr.msk.f32.gmra.mxu1 %vm595_vm2, %v792_v40  ;;  %1623 = vmatprep.subr.mxu1 %v1042_v21 }
 0x1b5   : > { %v793_v50 = vmax.f32 %v731_v45, 0.0  ;;  %1627 = vmatpush3.msra.mxu1 %v1042_v21  ;;  %v746_v55 = vadd.f32 %v1544_v48, %v1928_v22 }
 0x1b6   : > { %v740_v57 = vpop.f32.mrf.mxu1 }
 0x1b7   : > { %v741_v61 = vadd.f32 %v1928_v22, %v740_v57  ;;  %1571 = vmatprep.mubr.msk.f32.mxu1 %vm595_vm2, %v793_v50  ;;  %v796_v5 = vmax.f32 %v746_v55, 0.0  ;;  %v1041_v50 = vld [vmem:[%s2083_s7] sm:$0xff] }
 0x1b8   : > { %v1547_v63 = vpop.f32.mrf.mxu1  ;;  %1572 = vmatmul.mubr.msk.f32.gmra.mxu1 %vm595_vm2, %v794_v51  ;;  %1595 = vmatprep.subr.mxu0 %v1041_v50 }
 0x1b9   : > { %v795_v3 = vmax.f32 %v741_v61, 0.0  ;;  %v756_v9 = vadd.f32 %v1547_v63, %v1928_v22  ;;  %1624 = vmatprep.subr.mxu1 %v1041_v50  ;;  %1596 = vmatpush3.msra.mxu0 %v1041_v50 }
 0x1ba   : > { %v750_v11 = vpop.f32.mrf.mxu1  ;;  %1628 = vmatpush3.msra.mxu1 %v1041_v50 }
 0x1bb   : > { %v751_v15 = vadd.f32 %v1928_v22, %v750_v11  ;;  %1574 = vmatprep.mubr.msk.f32.mxu1 %vm595_vm2, %v795_v3  ;;  %v798_v21 = vmax.f32 %v756_v9, 0.0 }
 0x1bc   : > { %v1550_v19 = vpop.f32.mrf.mxu1  ;;  %1575 = vmatmul.mubr.msk.f32.gmra.mxu1 %vm595_vm2, %v796_v5 }
 0x1bd   : > { %v797_v20 = vmax.f32 %v751_v15, 0.0  ;;  %v766_v23 = vadd.f32 %v1550_v19, %v1928_v22 }
 0x1be   : > { %v760_v24 = vpop.f32.mrf.mxu1 }
 0x1bf   : > { %v761_v25 = vadd.f32 %v1928_v22, %v760_v24  ;;  %1577 = vmatprep.mubr.msk.f32.mxu1 %vm595_vm2, %v797_v20  ;;  %v800_v28 = vmax.f32 %v766_v23, 0.0 }
 0x1c0   : > { %v1553_v26 = vpop.f32.mrf.mxu1  ;;  %1578 = vmatmul.mubr.msk.f32.gmra.mxu1 %vm595_vm2, %v798_v21 }
 0x1c1   : > { %v799_v27 = vmax.f32 %v761_v25, 0.0  ;;  %v776_v29 = vadd.f32 %v1553_v26, %v1928_v22 }
 0x1c2   : > { %v770_v30 = vpop.f32.mrf.mxu1 }
 0x1c3   : > { %v771_v31 = vadd.f32 %v1928_v22, %v770_v30  ;;  %1580 = vmatprep.mubr.msk.f32.mxu1 %vm595_vm2, %v799_v27  ;;  %v802_v36 = vmax.f32 %v776_v29, 0.0 }
 0x1c4   : > { %v1556_v32 = vpop.f32.mrf.mxu1  ;;  %1581 = vmatmul.mubr.msk.f32.gmra.mxu1 %vm595_vm2, %v800_v28 }
 0x1c5   : > { %v801_v34 = vmax.f32 %v771_v31, 0.0  ;;  %v786_v40 = vadd.f32 %v1556_v32, %v1928_v22 }
 0x1c6   : > { %v780_v42 = vpop.f32.mrf.mxu1 }
 0x1c7   : > { %v781_v43 = vadd.f32 %v1928_v22, %v780_v42  ;;  %1583 = vmatprep.mubr.msk.f32.mxu1 %vm595_vm2, %v801_v34  ;;  %v804_v48 = vmax.f32 %v786_v40, 0.0  ;;  %v1968_v22 = vld [vmem:[%s2082_s6] ss:$0 sm:$0xff] }
 0x1c8   : > { %1584 = vmatmul.mubr.msk.f32.gmra.mxu1 %vm595_vm2, %v802_v36 }
 0x1c9   : > { %v803_v45 = vmax.f32 %v781_v43, 0.0 }
 0x1cb   : > { %1586 = vmatprep.mubr.msk.f32.mxu1 %vm595_vm2, %v803_v45 }
 0x1cc   : > { %1587 = vmatmul.mubr.msk.f32.gmra.mxu1 %vm595_vm2, %v804_v48 }
 0x270   : > { %v1567_v51 = vpop.f32.mrf.mxu1 }
 0x271   : > { %v936_v55 = vadd.f32 %v1567_v51, %v1968_v22 }
 0x272   : > { %v930_v57 = vpop.f32.mrf.mxu1 }
 0x273   : > { %v931_v61 = vadd.f32 %v1968_v22, %v930_v57  ;;  %v1010_v63 = vmax.f32 %v936_v55, 0.0 }
 0x274   : > { %v1570_v3 = vpop.f32.mrf.mxu1 }
 0x275   : > { %v1009_v5 = vmax.f32 %v931_v61, 0.0  ;;  %v946_v9 = vadd.f32 %v1570_v3, %v1968_v22  ;;  %v1026_v20 = vadd.f32 %v1010_v63, %v569_v38 }
 0x276   : > { %v940_v11 = vpop.f32.mrf.mxu1 }
 0x277   : > { %v1025_v15 = vadd.f32 %v1009_v5, %v568_v37  ;;  %v941_v19 = vadd.f32 %v1968_v22, %v940_v11  ;;  %v1012_v21 = vmax.f32 %v946_v9, 0.0 }
 0x278   : > { %v1573_v23 = vpop.f32.mrf.mxu1 }
 0x279   : > { %v1011_v24 = vmax.f32 %v941_v19, 0.0  ;;  %v956_v25 = vadd.f32 %v1573_v23, %v1968_v22  ;;  %1597 = vmatprep.mubr.msk.f32.mxu0 %vm595_vm2, %v1025_v15  ;;  %v1028_v37 = vadd.f32 %v1012_v21, %v571_v46 }
 0x27a   : > { %v950_v26 = vpop.f32.mrf.mxu1  ;;  %1598 = vmatmul.mubr.msk.f32.vlgmr.msra.gmra.mxu0 %vm595_vm2, %v1026_v20 }
 0x27b   : > { %v1027_v27 = vadd.f32 %v1011_v24, %v570_v44  ;;  %v951_v35 = vadd.f32 %v1968_v22, %v950_v26  ;;  %v1014_v33 = vmax.f32 %v956_v25, 0.0 }
 0x27c   : > { %v1576_v38 = vpop.f32.mrf.mxu1 }
 0x27d   : > { %v1013_v28 = vmax.f32 %v951_v35, 0.0  ;;  %v966_v29 = vadd.f32 %v1576_v38, %v1968_v22  ;;  %1600 = vmatprep.mubr.msk.f32.mxu0 %vm595_vm2, %v1027_v27  ;;  %v1030_v44 = vadd.f32 %v1014_v33, %v573_v53 }
 0x27e   : > { %v960_v30 = vpop.f32.mrf.mxu1  ;;  %1601 = vmatmul.mubr.msk.f32.gmra.mxu0 %vm595_vm2, %v1028_v37 }
 0x27f   : > { %v1029_v31 = vadd.f32 %v1013_v28, %v572_v52  ;;  %v961_v41 = vadd.f32 %v1968_v22, %v960_v30  ;;  %v1016_v39 = vmax.f32 %v966_v29, 0.0 }
 0x280   : > { %v1579_v46 = vpop.f32.mrf.mxu1 }
 0x281   : > { %v1015_v32 = vmax.f32 %v961_v41, 0.0  ;;  %v976_v34 = vadd.f32 %v1579_v46, %v1968_v22  ;;  %1603 = vmatprep.mubr.msk.f32.mxu0 %vm595_vm2, %v1029_v31  ;;  %v1032_v52 = vadd.f32 %v1016_v39, %v575_v59 }
 0x282   : > { %v970_v36 = vpop.f32.mrf.mxu1  ;;  %1604 = vmatmul.mubr.msk.f32.gmra.mxu0 %vm595_vm2, %v1030_v44 }
 0x283   : > { %v1031_v40 = vadd.f32 %v1015_v32, %v574_v58  ;;  %v971_v49 = vadd.f32 %v1968_v22, %v970_v36  ;;  %v1018_v47 = vmax.f32 %v976_v34, 0.0 }
 0x284   : > { %v1582_v53 = vpop.f32.mrf.mxu1 }
 0x285   : > { %v1017_v42 = vmax.f32 %v971_v49, 0.0  ;;  %v986_v43 = vadd.f32 %v1582_v53, %v1968_v22  ;;  %1606 = vmatprep.mubr.msk.f32.mxu0 %vm595_vm2, %v1031_v40  ;;  %v1034_v58 = vadd.f32 %v1018_v47, %v577_v1 }
 0x286   : > { %v980_v45 = vpop.f32.mrf.mxu1  ;;  %1607 = vmatmul.mubr.msk.f32.gmra.mxu0 %vm595_vm2, %v1032_v52 }
 0x287   : > { %v1033_v48 = vadd.f32 %v1017_v42, %v576_v0  ;;  %v981_v56 = vadd.f32 %v1968_v22, %v980_v45  ;;  %v1020_v54 = vmax.f32 %v986_v43, 0.0 }
 0x288   : > { %v1585_v59 = vpop.f32.mrf.mxu1 }
 0x289   : > { %v1019_v50 = vmax.f32 %v981_v56, 0.0  ;;  %v996_v51 = vadd.f32 %v1585_v59, %v1968_v22  ;;  %1609 = vmatprep.mubr.msk.f32.mxu0 %vm595_vm2, %v1033_v48  ;;  %v1036_v0 = vadd.f32 %v1020_v54, %v579_v7 }
 0x28a   : > { %v990_v55 = vpop.f32.mrf.mxu1  ;;  %1610 = vmatmul.mubr.msk.f32.gmra.mxu0 %vm595_vm2, %v1034_v58 }
 0x28b   : > { %v1035_v57 = vadd.f32 %v1019_v50, %v578_v6  ;;  %v991_v62 = vadd.f32 %v1968_v22, %v990_v55  ;;  %v1022_v60 = vmax.f32 %v996_v51, 0.0 }
 0x28c   : > { %v1588_v1 = vpop.f32.mrf.mxu1 }
 0x28d   : > { %v1021_v61 = vmax.f32 %v991_v62, 0.0  ;;  %v1006_v63 = vadd.f32 %v1588_v1, %v1968_v22  ;;  %1612 = vmatprep.mubr.msk.f32.mxu0 %vm595_vm2, %v1035_v57  ;;  %v1038_v2 = vadd.f32 %v1022_v60, %v581_v13 }
 0x28e   : > { %v1000_v3 = vpop.f32.mrf.mxu1  ;;  %1613 = vmatmul.mubr.msk.f32.gmra.mxu0 %vm595_vm2, %v1036_v0 }
 0x28f   : > { %v1037_v4 = vadd.f32 %v1021_v61, %v580_v12  ;;  %v1001_v6 = vadd.f32 %v1968_v22, %v1000_v3  ;;  %v1024_v7 = vmax.f32 %v1006_v63, 0.0 }
 0x291   : > { %v1023_v5 = vmax.f32 %v1001_v6, 0.0  ;;  %1615 = vmatprep.mubr.msk.f32.mxu0 %vm595_vm2, %v1037_v4  ;;  %v1040_v11 = vadd.f32 %v1024_v7, %v583_v18 }
 0x292   : > { %1616 = vmatmul.mubr.msk.f32.gmra.mxu0 %vm595_vm2, %v1038_v2 }
 0x293   : > { %v1039_v9 = vadd.f32 %v1023_v5, %v582_v17 }
 0x295   : > { %1618 = vmatprep.mubr.msk.f32.mxu1 %vm595_vm2, %v1039_v9 }
 0x296   : > { %1619 = vmatmul.mubr.msk.f32.vlgmr.msra.gmra.mxu1 %vm595_vm2, %v1040_v11 }
 0x33a   : > { %v1599_v8 = vpop.f32.mrf.mxu0 }
 0x33b   : > { %v1172_v12 = vadd.f32 %v1599_v8, %v1379_v10 }
 0x33c   : > { %v1166_v13 = vpop.f32.mrf.mxu0 }
 0x33d   : > { %1247 = vst.msk [vmem:[%s2039_s29 + $0x8] sm:$0xff] %vm1245_vm3, %v1172_v12  ;;  %v1167_v14 = vadd.f32 %v1379_v10, %v1166_v13 }
 0x33e   : > { %v1602_v16 = vpop.f32.mrf.mxu0 }
 0x33f   : > { %1246 = vst.msk [vmem:[%s2039_s29] sm:$0xff] %vm1245_vm3, %v1167_v14  ;;  %v1182_v17 = vadd.f32 %v1602_v16, %v1379_v10 }
 0x340   : > { %v1176_v18 = vpop.f32.mrf.mxu0 }
 0x341   : > { %1249 = vst.msk [vmem:[%s2039_s29 + $0x18] sm:$0xff] %vm1245_vm3, %v1182_v17  ;;  %v1177_v22 = vadd.f32 %v1379_v10, %v1176_v18 }
 0x342   : > { %v1605_v15 = vpop.f32.mrf.mxu0 }
 0x343   : > { %1248 = vst.msk [vmem:[%s2039_s29 + $0x10] sm:$0xff] %vm1245_vm3, %v1177_v22  ;;  %v1192_v19 = vadd.f32 %v1605_v15, %v1379_v10 }
 0x344   : > { %v1186_v20 = vpop.f32.mrf.mxu0 }
 0x345   : > { %1251 = vst.msk [vmem:[%s2039_s29 + $0x28] sm:$0xff] %vm1245_vm3, %v1192_v19  ;;  %v1187_v21 = vadd.f32 %v1379_v10, %v1186_v20 }
 0x346   : > { %v1608_v23 = vpop.f32.mrf.mxu0 }
 0x347   : > { %1250 = vst.msk [vmem:[%s2039_s29 + $0x20] sm:$0xff] %vm1245_vm3, %v1187_v21  ;;  %v1202_v24 = vadd.f32 %v1608_v23, %v1379_v10 }
 0x348   : > { %v1196_v25 = vpop.f32.mrf.mxu0 }
 0x349   : > { %1253 = vst.msk [vmem:[%s2039_s29 + $0x38] sm:$0xff] %vm1245_vm3, %v1202_v24  ;;  %v1197_v26 = vadd.f32 %v1379_v10, %v1196_v25 }
 0x34a   : > { %v1611_v27 = vpop.f32.mrf.mxu0 }
 0x34b   : > { %1252 = vst.msk [vmem:[%s2039_s29 + $0x30] sm:$0xff] %vm1245_vm3, %v1197_v26  ;;  %v1212_v35 = vadd.f32 %v1611_v27, %v1379_v10 }
 0x34c   : > { %v1206_v37 = vpop.f32.mrf.mxu0 }
 0x34d   : > { %1255 = vst.msk [vmem:[%s2039_s29 + $0x48] sm:$0xff] %vm1245_vm3, %v1212_v35  ;;  %v1207_v33 = vadd.f32 %v1379_v10, %v1206_v37 }
 0x34e   : > { %v1614_v38 = vpop.f32.mrf.mxu0 }
 0x34f   : > { %1254 = vst.msk [vmem:[%s2039_s29 + $0x40] sm:$0xff] %vm1245_vm3, %v1207_v33  ;;  %v1222_v28 = vadd.f32 %v1614_v38, %v1379_v10 }
 0x350   : > { %v1216_v29 = vpop.f32.mrf.mxu0 }
 0x351   : > { %1257 = vst.msk [vmem:[%s2039_s29 + $0x58] sm:$0xff] %vm1245_vm3, %v1222_v28  ;;  %v1217_v30 = vadd.f32 %v1379_v10, %v1216_v29 }
 0x352   : > { %v1617_v31 = vpop.f32.mrf.mxu0 }
 0x353   : > { %1256 = vst.msk [vmem:[%s2039_s29 + $0x50] sm:$0xff] %vm1245_vm3, %v1217_v30  ;;  %v1232_v41 = vadd.f32 %v1617_v31, %v1379_v10 }
 0x354   : > { %v1226_v44 = vpop.f32.mrf.mxu0 }
 0x355   : > { %1259 = vst.msk [vmem:[%s2039_s29 + $0x68] sm:$0xff] %vm1245_vm3, %v1232_v41  ;;  %v1227_v39 = vadd.f32 %v1379_v10, %v1226_v44 }
 0x356   : > { %v1620_v46 = vpop.f32.mrf.mxu1 }
 0x357   : > { %1258 = vst.msk [vmem:[%s2039_s29 + $0x60] sm:$0xff] %vm1245_vm3, %v1227_v39  ;;  %v1242_v32 = vadd.f32 %v1620_v46, %v1379_v10 }
 0x358   : > { %v1236_v34 = vpop.f32.mrf.mxu1 }
 0x359   : > { %1261 = vst.msk [vmem:[%s2039_s29 + $0x78] sm:$0xff] %vm1245_vm3, %v1242_v32  ;;  %v1237_v36 = vadd.f32 %v1379_v10, %v1236_v34 }
 0x35b   : > { %1260 = vst.msk [vmem:[%s2039_s29 + $0x70] sm:$0xff] %vm1245_vm3, %v1237_v36 }
 0x35c PF: > { %s21_s11 = sadd.s32 1, %s1643_s11  }
 0x35d   : > { %p18_p4 = scmp.ge.s32.totalorder %s21_s11, 5  }
 0x35f   :  { %20 = sbr.rel (!%p18_p4) target bundleno = 3 (0x3), region = 86 }

</bundles_post_ra>
